<compile_context>
chip_gen: v7x
topology: tpu7x:2x2x1
jax: 0.10.0
libtpu: 0.0.40
codegen_flags: <defaults>
</compile_context>

<pallas_src>
import functools
import math

import jax
import jax.numpy as jnp
from jax import lax
from jax.experimental import pallas as pl
from jax.experimental.pallas import tpu as pltpu


def _mha_head_kernel(q_ref, k_ref, v_ref, wq_ref, wk_ref, wv_ref, wo_ref,
                     bo_ref, o_ref, acc_ref, *, compute_dtype):
    """One (batch, Sq-tile, head) grid step.

    Refs:
      q_ref: (1, 1, Tq, D)   k_ref / v_ref: (1, 1, Sk, D)   (head-major inputs)
      wq/wk/wv_ref: (D, D) pre-transposed; 1/sqrt(D) folded into wq
      wo_ref: (D, E) row-slice of Wo.T for this head
      bo_ref: (1, E) f32 bias
      o_ref:  (1, Tq, E)   acc_ref: (Tq, E) f32 scratch accumulator
    """
    h = pl.program_id(2)

    @pl.when(h == 0)
    def _():
        acc_ref[...] = jnp.zeros_like(acc_ref)

    cd = compute_dtype
    xq = q_ref[0, 0].astype(cd)            # (Tq, D)
    xk = k_ref[0, 0].astype(cd)            # (Sk, D)
    xv = v_ref[0, 0].astype(cd)            # (Sk, D)

    # Shared per-head projections (weights already transposed; scale folded
    # into wq) — MXU with f32 accumulation.
    q = jnp.dot(xq, wq_ref[...], preferred_element_type=jnp.float32)
    k = jnp.dot(xk, wk_ref[...], preferred_element_type=jnp.float32)
    v = jnp.dot(xv, wv_ref[...], preferred_element_type=jnp.float32)

    # Scores: contract last axes directly (no transposed copy of K in VMEM).
    s = lax.dot_general(q.astype(cd), k.astype(cd), (((1,), (1,)), ((), ())),
                        preferred_element_type=jnp.float32)      # (Tq, Sk)

    # Softmax in f32 on VPU/EUP; divide replaced by EUP reciprocal.
    s = s - jnp.max(s, axis=-1, keepdims=True)
    p = jnp.exp(s)
    denom = jnp.sum(p, axis=-1, keepdims=True)
    p = p * pl.reciprocal(denom, approx=True)

    ctx = jnp.dot(p.astype(cd), v.astype(cd),
                  preferred_element_type=jnp.float32)             # (Tq, D)

    # Per-head contribution to the output projection — no concat / relayout.
    acc_ref[...] += jnp.dot(ctx.astype(cd), wo_ref[...],
                            preferred_element_type=jnp.float32)   # (Tq, E)

    @pl.when(h == pl.num_programs(2) - 1)
    def _():
        o_ref[0] = (acc_ref[...] + bo_ref[...]).astype(o_ref.dtype)


def prepare_params(params, heads, compute_dtype=jnp.bfloat16):
    """One-time weight prep: transpose, fold the softmax scale into wq,
    cast MXU weights to the compute dtype. Call once, not per forward."""
    wq, wk, wv, wo, bo = params
    D = wq.shape[0]
    scale = 1.0 / math.sqrt(D)
    wq_t = (wq.T * scale).astype(compute_dtype)
    wk_t = wk.T.astype(compute_dtype)
    wv_t = wv.T.astype(compute_dtype)
    wo_t = wo.T.astype(compute_dtype)
    bo2 = bo.reshape(1, -1).astype(jnp.float32)
    return wq_t, wk_t, wv_t, wo_t, bo2


def _pick_q_tile(sq, target=256):
    if sq <= target:
        return sq
    for cand in range(min(target, sq), 7, -1):
        if sq % cand == 0 and cand % 8 == 0:
            return cand
    return sq


def _vmem_limit_bytes(tq, sk, d, e, in_itemsize, cd_itemsize):
    # double-buffered inputs/weights + output + scratch + score temporaries
    dbuf = 2 * in_itemsize * (tq * d + 2 * sk * d) \
         + 2 * cd_itemsize * (3 * d * d + d * e) + 2 * 4 * e
    out = 2 * 4 * tq * e
    scratch = 4 * tq * e
    temps = 4 * (4 * tq * sk + tq * d + 2 * sk * d + tq * e)
    need = dbuf + out + scratch + temps + (8 << 20)   # headroom for relayouts
    return int(min(max(need, 16 << 20), 64 << 20))


def multi_head_attention(query, key, value, prepared, heads, *,
                         q_tile=256, compute_dtype=jnp.bfloat16):
    """query: (B, Sq, E), key/value: (B, Sk, E) -> (B, Sq, E)."""
    wq_t, wk_t, wv_t, wo_t, bo2 = prepared
    B, Sq, E = query.shape
    Sk = key.shape[1]
    H = heads
    D = E // H

    # Head-major layout plumbing in the wrapper: (B, S, E) -> (B, H, S, D) so
    # each grid step sees a compact per-head (S, D) slab.
    q4 = query.reshape(B, Sq, H, D).transpose(0, 2, 1, 3)
    k4 = key.reshape(B, Sk, H, D).transpose(0, 2, 1, 3)
    v4 = value.reshape(B, Sk, H, D).transpose(0, 2, 1, 3)

    tq = _pick_q_tile(Sq, q_tile)
    grid = (B, Sq // tq, H)

    in_itemsize = jnp.dtype(query.dtype).itemsize
    cd_itemsize = jnp.dtype(compute_dtype).itemsize

    steps = B * (Sq // tq) * H
    flops_per_step = 2 * (tq * D * D + 2 * Sk * D * D + 2 * tq * Sk * D
                          + tq * D * E)
    cost = pl.CostEstimate(
        flops=steps * flops_per_step,
        transcendentals=B * H * Sq * Sk,
        bytes_accessed=int(
            B * H * Sq * D * in_itemsize
            + 2 * steps * Sk * D * in_itemsize
            + steps * (3 * D * D + D * E) * cd_itemsize
            + B * Sq * E * in_itemsize),
    )

    kernel = functools.partial(_mha_head_kernel, compute_dtype=compute_dtype)

    return pl.pallas_call(
        kernel,
        out_shape=jax.ShapeDtypeStruct((B, Sq, E), query.dtype),
        grid_spec=pltpu.PrefetchScalarGridSpec(
            num_scalar_prefetch=0,
            grid=grid,
            in_specs=[
                pl.BlockSpec((1, 1, tq, D), lambda b, i, h: (b, h, i, 0)),
                pl.BlockSpec((1, 1, Sk, D), lambda b, i, h: (b, h, 0, 0)),
                pl.BlockSpec((1, 1, Sk, D), lambda b, i, h: (b, h, 0, 0)),
                pl.BlockSpec((D, D), lambda b, i, h: (0, 0)),
                pl.BlockSpec((D, D), lambda b, i, h: (0, 0)),
                pl.BlockSpec((D, D), lambda b, i, h: (0, 0)),
                pl.BlockSpec((D, E), lambda b, i, h: (h, 0)),
                pl.BlockSpec((1, E), lambda b, i, h: (0, 0)),
            ],
            out_specs=pl.BlockSpec((1, tq, E), lambda b, i, h: (b, i, 0)),
            scratch_shapes=[pltpu.VMEM((tq, E), jnp.float32)],
        ),
        compiler_params=pltpu.CompilerParams(
            dimension_semantics=("parallel", "parallel", "arbitrary"),
            vmem_limit_bytes=_vmem_limit_bytes(tq, Sk, D, E,
                                               in_itemsize, cd_itemsize),
        ),
        cost_estimate=cost,
    )(q4, k4, v4, wq_t, wk_t, wv_t, wo_t, bo2)


def _init_params(key, embedding_length, heads):
    """Deterministic init mirroring nn.Linear default shapes/bounds."""
    D = embedding_length // heads
    E = embedding_length
    k0, k1, k2, k3, k4 = jax.random.split(key, 5)
    bd = 1.0 / math.sqrt(D)
    be = 1.0 / math.sqrt(E)
    wq = jax.random.uniform(k0, (D, D), jnp.float32, -bd, bd)
    wk = jax.random.uniform(k1, (D, D), jnp.float32, -bd, bd)
    wv = jax.random.uniform(k2, (D, D), jnp.float32, -bd, bd)
    wo = jax.random.uniform(k3, (E, E), jnp.float32, -be, be)
    bo = jax.random.uniform(k4, (E,), jnp.float32, -be, be)
    return wq, wk, wv, wo, bo


def _reference(query, key, value, params, heads):
    """Pure-JAX f32 reference replicating the PyTorch forward pass."""
    wq, wk, wv, wo, bo = params
    B, Sq, E = query.shape
    Sk = key.shape[1]
    D = E // heads
    q = query.reshape(B, Sq, heads, D) @ wq.T
    k = key.reshape(B, Sk, heads, D) @ wk.T
    v = value.reshape(B, Sk, heads, D) @ wv.T
    q = q.transpose(0, 2, 1, 3)
    k = k.transpose(0, 2, 1, 3)
    v = v.transpose(0, 2, 1, 3)
    s = jnp.einsum("bhqd,bhkd->bhqk", q, k) / math.sqrt(D)
    w = jax.nn.softmax(s, axis=-1)
    ctx = jnp.einsum("bhqk,bhkd->bhqd", w, v)
    ctx = ctx.transpose(0, 2, 1, 3).reshape(B, Sq, E)
    return ctx @ wo.T + bo


if __name__ == "__main__":
    B, Sq, Sk = 2, 8, 8
    E, H = 32, 4

    root = jax.random.PRNGKey(0)
    kq, kk, kv, kp = jax.random.split(root, 4)
    query = jax.random.normal(kq, (B, Sq, E), jnp.float32)
    key = jax.random.normal(kk, (B, Sk, E), jnp.float32)
    value = jax.random.normal(kv, (B, Sk, E), jnp.float32)
    params = _init_params(kp, E, H)

    prepared = prepare_params(params, H, compute_dtype=jnp.bfloat16)
    out = multi_head_attention(query, key, value, prepared, H)
    out = jax.block_until_ready(out)

    ref = _reference(query, key, value, params, H)
    assert out.shape == (B, Sq, E)
    # bf16 MXU operands + approx reciprocal -> loose-but-meaningful tolerance.
    assert jnp.allclose(out, ref, atol=2e-2, rtol=2e-2), "mismatch vs reference"

    print("KERNEL_OK")
</pallas_src>

<mosaic_0001>
module attributes {stable_mosaic.version = 11 : i64} {
  func.func @_mha_head_kernel(%arg0: i32, %arg1: i32, %arg2: i32, %arg3: memref<1x1x8x8xf32, #tpu.memory_space<vmem>>, %arg4: memref<1x1x8x8xf32, #tpu.memory_space<vmem>>, %arg5: memref<1x1x8x8xf32, #tpu.memory_space<vmem>>, %arg6: memref<8x8xbf16, #tpu.memory_space<vmem>>, %arg7: memref<8x8xbf16, #tpu.memory_space<vmem>>, %arg8: memref<8x8xbf16, #tpu.memory_space<vmem>>, %arg9: memref<8x32xbf16, #tpu.memory_space<vmem>>, %arg10: memref<1x32xf32, #tpu.memory_space<vmem>>, %arg11: memref<1x8x32xf32, #tpu.memory_space<vmem>>, %arg12: memref<8x32xf32, #tpu.memory_space<vmem>>) attributes {dimension_semantics = [#tpu.dimension_semantics<parallel>, #tpu.dimension_semantics<parallel>, #tpu.dimension_semantics<arbitrary>], iteration_bounds = array<i64: 2, 1, 4>, scalar_prefetch = 0 : i64, scratch_operands = 1 : i64, tpu.core_type = #tpu.core_type<tc>, window_params = [{transform_indices = @transform_0, window_bounds = array<i64: 1, 1, 8, 8>}, {transform_indices = @transform_1, window_bounds = array<i64: 1, 1, 8, 8>}, {transform_indices = @transform_2, window_bounds = array<i64: 1, 1, 8, 8>}, {pipeline_mode = #tpu.pipeline_mode<synchronous>, transform_indices = @transform_3, window_bounds = array<i64: 8, 8>}, {pipeline_mode = #tpu.pipeline_mode<synchronous>, transform_indices = @transform_4, window_bounds = array<i64: 8, 8>}, {pipeline_mode = #tpu.pipeline_mode<synchronous>, transform_indices = @transform_5, window_bounds = array<i64: 8, 8>}, {transform_indices = @transform_6, window_bounds = array<i64: 8, 32>}, {pipeline_mode = #tpu.pipeline_mode<synchronous>, transform_indices = @transform_7, window_bounds = array<i64: 1, 32>}, {transform_indices = @transform_8, window_bounds = array<i64: 1, 8, 32>}]} {
    %c0_i32 = arith.constant 0 : i32
    %0 = arith.cmpi eq, %arg2, %c0_i32 : i32
    %1 = arith.extui %0 : i1 to i32
    %c0_i32_0 = arith.constant 0 : i32
    %2 = arith.cmpi ne, %1, %c0_i32_0 : i32
    scf.if %2 {
      %cst_32 = arith.constant 0.000000e+00 : f32
      %43 = vector.broadcast %cst_32 : f32 to vector<8x32xf32>
      %c0_33 = arith.constant 0 : index
      %c0_34 = arith.constant 0 : index
      %44 = vector.load %arg12[%c0_33, %c0_34] : memref<8x32xf32, #tpu.memory_space<vmem>>, vector<8x32xf32>
      tpu.vector_store %arg12[%c0_33, %c0_34], %43 {strides = array<i32>} : memref<8x32xf32, #tpu.memory_space<vmem>>, vector<8x32xf32>,
    } else {
    }
    %c0 = arith.constant 0 : index
    %c0_1 = arith.constant 0 : index
    %c0_2 = arith.constant 0 : index
    %c0_3 = arith.constant 0 : index
    %3 = vector.load %arg3[%c0, %c0_1, %c0_2, %c0_3] : memref<1x1x8x8xf32, #tpu.memory_space<vmem>>, vector<1x1x8x8xf32>
    %4 = vector.shape_cast %3 : vector<1x1x8x8xf32> to vector<8x8xf32>
    %5 = arith.truncf %4 : vector<8x8xf32> to vector<8x8xbf16>
    %c0_4 = arith.constant 0 : index
    %c0_5 = arith.constant 0 : index
    %c0_6 = arith.constant 0 : index
    %c0_7 = arith.constant 0 : index
    %6 = vector.load %arg4[%c0_4, %c0_5, %c0_6, %c0_7] : memref<1x1x8x8xf32, #tpu.memory_space<vmem>>, vector<1x1x8x8xf32>
    %7 = vector.shape_cast %6 : vector<1x1x8x8xf32> to vector<8x8xf32>
    %8 = arith.truncf %7 : vector<8x8xf32> to vector<8x8xbf16>
    %c0_8 = arith.constant 0 : index
    %c0_9 = arith.constant 0 : index
    %c0_10 = arith.constant 0 : index
    %c0_11 = arith.constant 0 : index
    %9 = vector.load %arg5[%c0_8, %c0_9, %c0_10, %c0_11] : memref<1x1x8x8xf32, #tpu.memory_space<vmem>>, vector<1x1x8x8xf32>
    %10 = vector.shape_cast %9 : vector<1x1x8x8xf32> to vector<8x8xf32>
    %11 = arith.truncf %10 : vector<8x8xf32> to vector<8x8xbf16>
    %c0_12 = arith.constant 0 : index
    %c0_13 = arith.constant 0 : index
    %12 = vector.load %arg6[%c0_12, %c0_13] : memref<8x8xbf16, #tpu.memory_space<vmem>>, vector<8x8xbf16>
    %cst = arith.constant dense<0.000000e+00> : vector<8x8xf32>
    %13 = tpu.matmul %5, %12, %cst {dimension_numbers = #tpu.dot_dimension_numbers<[1], [0], [0], [1], [0, 0, 1, 1], [], []>} : vector<8x8xbf16>, vector<8x8xbf16>, vector<8x8xf32> -> vector<8x8xf32>
    %c0_14 = arith.constant 0 : index
    %c0_15 = arith.constant 0 : index
    %14 = vector.load %arg7[%c0_14, %c0_15] : memref<8x8xbf16, #tpu.memory_space<vmem>>, vector<8x8xbf16>
    %cst_16 = arith.constant dense<0.000000e+00> : vector<8x8xf32>
    %15 = tpu.matmul %8, %14, %cst_16 {dimension_numbers = #tpu.dot_dimension_numbers<[1], [0], [0], [1], [0, 0, 1, 1], [], []>} : vector<8x8xbf16>, vector<8x8xbf16>, vector<8x8xf32> -> vector<8x8xf32>
    %c0_17 = arith.constant 0 : index
    %c0_18 = arith.constant 0 : index
    %16 = vector.load %arg8[%c0_17, %c0_18] : memref<8x8xbf16, #tpu.memory_space<vmem>>, vector<8x8xbf16>
    %cst_19 = arith.constant dense<0.000000e+00> : vector<8x8xf32>
    %17 = tpu.matmul %11, %16, %cst_19 {dimension_numbers = #tpu.dot_dimension_numbers<[1], [0], [0], [1], [0, 0, 1, 1], [], []>} : vector<8x8xbf16>, vector<8x8xbf16>, vector<8x8xf32> -> vector<8x8xf32>
    %18 = arith.truncf %13 : vector<8x8xf32> to vector<8x8xbf16>
    %19 = arith.truncf %15 : vector<8x8xf32> to vector<8x8xbf16>
    %cst_20 = arith.constant dense<0.000000e+00> : vector<8x8xf32>
    %20 = tpu.matmul %18, %19, %cst_20 {dimension_numbers = #tpu.dot_dimension_numbers<[1], [1], [0], [0], [0, 0, 1, 0], [], []>} : vector<8x8xbf16>, vector<8x8xbf16>, vector<8x8xf32> -> vector<8x8xf32>
    %cst_21 = arith.constant dense<0xFF800000> : vector<8xf32>
    %21 = vector.multi_reduction <maximumf>, %20, %cst_21 [1] : vector<8x8xf32> to vector<8xf32>
    %22 = vector.shape_cast %21 : vector<8xf32> to vector<8x1xf32>
    %23 = vector.broadcast %22 : vector<8x1xf32> to vector<8x8xf32>
    %24 = arith.subf %20, %23 : vector<8x8xf32>
    %25 = math.exp %24 : vector<8x8xf32>
    %cst_22 = arith.constant dense<0.000000e+00> : vector<8xf32>
    %26 = vector.multi_reduction <add>, %25, %cst_22 [1] : vector<8x8xf32> to vector<8xf32>
    %27 = vector.shape_cast %26 : vector<8xf32> to vector<8x1xf32>
    %28 = tpu.reciprocal %27 {approx = true} : vector<8x1xf32> -> vector<8x1xf32>
    %29 = vector.broadcast %28 : vector<8x1xf32> to vector<8x8xf32>
    %30 = arith.mulf %25, %29 : vector<8x8xf32>
    %31 = arith.truncf %30 : vector<8x8xf32> to vector<8x8xbf16>
    %32 = arith.truncf %17 : vector<8x8xf32> to vector<8x8xbf16>
    %cst_23 = arith.constant dense<0.000000e+00> : vector<8x8xf32>
    %33 = tpu.matmul %31, %32, %cst_23 {dimension_numbers = #tpu.dot_dimension_numbers<[1], [0], [0], [1], [0, 0, 1, 1], [], []>} : vector<8x8xbf16>, vector<8x8xbf16>, vector<8x8xf32> -> vector<8x8xf32>
    %c0_24 = arith.constant 0 : index
    %c0_25 = arith.constant 0 : index
    %34 = vector.load %arg12[%c0_24, %c0_25] : memref<8x32xf32, #tpu.memory_space<vmem>>, vector<8x32xf32>
    %35 = arith.truncf %33 : vector<8x8xf32> to vector<8x8xbf16>
    %c0_26 = arith.constant 0 : index
    %c0_27 = arith.constant 0 : index
    %36 = vector.load %arg9[%c0_26, %c0_27] : memref<8x32xbf16, #tpu.memory_space<vmem>>, vector<8x32xbf16>
    %cst_28 = arith.constant dense<0.000000e+00> : vector<8x32xf32>
    %37 = tpu.matmul %35, %36, %cst_28 {dimension_numbers = #tpu.dot_dimension_numbers<[1], [0], [0], [1], [0, 0, 1, 1], [], []>} : vector<8x8xbf16>, vector<8x32xbf16>, vector<8x32xf32> -> vector<8x32xf32>
    %38 = arith.addf %34, %37 : vector<8x32xf32>
    %c0_29 = arith.constant 0 : index
    %c0_30 = arith.constant 0 : index
    %39 = vector.load %arg12[%c0_29, %c0_30] : memref<8x32xf32, #tpu.memory_space<vmem>>, vector<8x32xf32>
    tpu.vector_store %arg12[%c0_29, %c0_30], %38 {strides = array<i32>} : memref<8x32xf32, #tpu.memory_space<vmem>>, vector<8x32xf32>,
    %c3_i32 = arith.constant 3 : i32
    %40 = arith.cmpi eq, %arg2, %c3_i32 : i32
    %41 = arith.extui %40 : i1 to i32
    %c0_i32_31 = arith.constant 0 : i32
    %42 = arith.cmpi ne, %41, %c0_i32_31 : i32
    scf.if %42 {
      %c0_32 = arith.constant 0 : index
      %c0_33 = arith.constant 0 : index
      %43 = vector.load %arg12[%c0_32, %c0_33] : memref<8x32xf32, #tpu.memory_space<vmem>>, vector<8x32xf32>
      %c0_34 = arith.constant 0 : index
      %c0_35 = arith.constant 0 : index
      %44 = vector.load %arg10[%c0_34, %c0_35] : memref<1x32xf32, #tpu.memory_space<vmem>>, vector<1x32xf32>
      %45 = vector.broadcast %44 : vector<1x32xf32> to vector<8x32xf32>
      %46 = arith.addf %43, %45 : vector<8x32xf32>
      %c0_36 = arith.constant 0 : index
      %c0_37 = arith.constant 0 : index
      %c0_38 = arith.constant 0 : index
      %47 = vector.load %arg11[%c0_36, %c0_37, %c0_38] : memref<1x8x32xf32, #tpu.memory_space<vmem>>, vector<1x8x32xf32>
      %48 = vector.shape_cast %47 : vector<1x8x32xf32> to vector<8x32xf32>
      %49 = vector.shape_cast %46 : vector<8x32xf32> to vector<1x8x32xf32>
      tpu.vector_store %arg11[%c0_36, %c0_37, %c0_38], %49 {strides = array<i32>} : memref<1x8x32xf32, #tpu.memory_space<vmem>>, vector<1x8x32xf32>,
    } else {
    }
    return
  }
  func.func @transform_0(%arg0: i32, %arg1: i32, %arg2: i32) -> (i32, i32, i32, i32) {
    %c0_i32 = arith.constant 0 : i32
    %c0_i32_0 = arith.constant 0 : i32
    return %arg0, %arg2, %arg1, %c0_i32 : i32, i32, i32, i32
  }
  func.func @transform_1(%arg0: i32, %arg1: i32, %arg2: i32) -> (i32, i32, i32, i32) {
    %c0_i32 = arith.constant 0 : i32
    %c0_i32_0 = arith.constant 0 : i32
    %c0_i32_1 = arith.constant 0 : i32
    return %arg0, %arg2, %c0_i32, %c0_i32_0 : i32, i32, i32, i32
  }
  func.func @transform_2(%arg0: i32, %arg1: i32, %arg2: i32) -> (i32, i32, i32, i32) {
    %c0_i32 = arith.constant 0 : i32
    %c0_i32_0 = arith.constant 0 : i32
    %c0_i32_1 = arith.constant 0 : i32
    return %arg0, %arg2, %c0_i32, %c0_i32_0 : i32, i32, i32, i32
  }
  func.func @transform_3(%arg0: i32, %arg1: i32, %arg2: i32) -> (i32, i32) {
    %c0_i32 = arith.constant 0 : i32
    %c0_i32_0 = arith.constant 0 : i32
    %c0_i32_1 = arith.constant 0 : i32
    return %c0_i32, %c0_i32_0 : i32, i32
  }
  func.func @transform_4(%arg0: i32, %arg1: i32, %arg2: i32) -> (i32, i32) {
    %c0_i32 = arith.constant 0 : i32
    %c0_i32_0 = arith.constant 0 : i32
    %c0_i32_1 = arith.constant 0 : i32
    return %c0_i32, %c0_i32_0 : i32, i32
  }
  func.func @transform_5(%arg0: i32, %arg1: i32, %arg2: i32) -> (i32, i32) {
    %c0_i32 = arith.constant 0 : i32
    %c0_i32_0 = arith.constant 0 : i32
    %c0_i32_1 = arith.constant 0 : i32
    return %c0_i32, %c0_i32_0 : i32, i32
  }
  func.func @transform_6(%arg0: i32, %arg1: i32, %arg2: i32) -> (i32, i32) {
    %c0_i32 = arith.constant 0 : i32
    %c0_i32_0 = arith.constant 0 : i32
    return %arg2, %c0_i32 : i32, i32
  }
  func.func @transform_7(%arg0: i32, %arg1: i32, %arg2: i32) -> (i32, i32) {
    %c0_i32 = arith.constant 0 : i32
    %c0_i32_0 = arith.constant 0 : i32
    %c0_i32_1 = arith.constant 0 : i32
    return %c0_i32, %c0_i32_0 : i32, i32
  }
  func.func @transform_8(%arg0: i32, %arg1: i32, %arg2: i32) -> (i32, i32, i32) {
    %c0_i32 = arith.constant 0 : i32
    %c0_i32_0 = arith.constant 0 : i32
    return %arg0, %arg1, %c0_i32 : i32, i32, i32
  }
}

</mosaic_0001>

<bundles_post_ra>
// kernel: tpu_custom_call.1
= control target key start
LH: loop header
LB: loop body
LE: loop exit
PB: predicated region body
PF: predicated region fallthrough
CT: control target
= control target key end

     0   :  { %s1949_s0 = inlined_call_operand.hbm [shape: f32[2,4,8,8], index: 0, kind: input, shape index: {}]   ;;  %s1950_s1 = inlined_call_operand.hbm [shape: f32[2,4,8,8], index: 1, kind: input, shape index: {}]   ;;  %s1951_s2 = inlined_call_operand.hbm [shape: f32[2,4,8,8], index: 2, kind: input, shape index: {}]   ;;  %s1952_s3 = inlined_call_operand.vmem [shape: bf16[8,8], index: 3, kind: input, shape index: {}]   ;;  %s1953_s4 = inlined_call_operand.hbm [shape: bf16[8,8], index: 4, kind: input, shape index: {}]   ;;  %s1954_s5 = inlined_call_operand.hbm [shape: bf16[8,8], index: 5, kind: input, shape index: {}]   ;;  %s1955_s6 = inlined_call_operand.vmem [shape: bf16[32,32], index: 6, kind: input, shape index: {}]   ;;  %s1956_s7 = inlined_call_operand.vmem [shape: f32[1,32], index: 7, kind: input, shape index: {}]   ;;  %s1957_s8 = inlined_call_operand.hbm [shape: f32[2,8,32], index: 8, kind: output, shape index: {}]  }
   0x1   :  { %1979 = sst [smem:[#allocation26_spill]] %s1950_s1 }
   0x2   :  { %1980 = sst [smem:[#allocation27_spill]] %s1952_s3 }
   0x3   :  { %1981 = sst [smem:[#allocation28_spill]] %s1953_s4 }
   0x4   :  { %1982 = sst [smem:[#allocation29_spill]] %s1954_s5 }
   0x5   :  { %1983 = sst [smem:[#allocation30_spill]] %s1956_s7 }
   0x6   :  { %1984 = sst [smem:[#allocation31_spill]] %s1957_s8 }
   0x7   :  { %13 = vsyncpa [#allocation4], 0 }
   0x8   :  { %15 = vsyncpa [#allocation4 + $0x1], 0 }
   0x9   :  { %16 = vsyncpa [#allocation7], 0 }
   0xa   :  { %18 = vsyncpa [#allocation7 + $0x1], 0 }
   0xb   :  { %19 = vsyncpa [#allocation10], 0 }
   0xc   :  { %20 = vsyncpa [#allocation5], 0 }
   0xd   :  { %22 = vsyncpa [#allocation5 + $0x1], 0  ;;  %s1536_s27 = smov 0   ;;  %s1538_s28 = smov 0  }
   0xe   :  { %s1540_s29 = smov 0   ;;  %s1542_s30 = smov 0  }
   0xf   :  { %s1544_s9 = smov 0   ;;  %s1546_s10 = smov 0  }
  0x10   :  { %s1548_s11 = smov 0   ;;  %s1550_s12 = smov 0  }
  0x11   :  { %s1552_s13 = smov 0   ;;  %s1554_s14 = smov 0  }
  0x12   :  { %s1556_s15 = smov 0  }
  0x13 LB: > { %1985 = sst [smem:[#allocation17_spill]] %s1440_s27  ;;  %s1590_s16 = sadd.s32 4294967295, %s1480_s15   ;;  %s1480_s15 = sphi %s1556_s15, %s28_s15   ;;  %s1476_s14 = sphi %s1554_s14, %s2030_s14   ;;  %s1472_s13 = sphi %s1552_s13, %s2029_s13   ;;  %s1468_s12 = sphi %s1550_s12, %s2028_s12   ;;  %s1464_s11 = sphi %s1548_s11, %s2027_s11   ;;  %s1460_s10 = sphi %s1546_s10, %s2036_s10   ;;  %s1456_s9 = sphi %s1544_s9, %s2035_s9   ;;  %s1452_s30 = sphi %s1542_s30, %s2034_s30   ;;  %s1448_s29 = sphi %s1540_s29, %s2033_s29   ;;  %s1444_s28 = sphi %s1538_s28, %s2032_s28   ;;  %s1440_s27 = sphi %s1536_s27, %s2031_s27  }
  0x14   : > { %1986 = sst [smem:[#allocation18_spill]] %s1468_s12  ;;  %s981_s17 = sadd.s32 4294967294, %s1480_s15  }
  0x15   : > { %1987 = sst [smem:[#allocation19_spill]] %s1472_s13  ;;  %p71_p0 = scmp.ne.s32.totalorder %s1456_s9, %s1452_s30 }
  0x16   : > { %1988 = sst [smem:[#allocation20_spill]] %s1476_s14  ;;  %p1963_p1 = scmp.eq.s32.totalorder %s1590_s16, 0 }
  0x17   : > { %p262_p2 = scmp.ne.s32.totalorder %s1448_s29, %s1444_s28  ;;  %p263_p4 = scmp.eq.s32.totalorder %s1590_s16, 7 }
  0x18   : > { %p1600_p3 = por %p1963_p1, %p71_p0  ;;  %p268_p5 = scmp.ne.s32.totalorder %s1444_s28, %s1440_s27 }
  0x19   : > { %p269_p6 = scmp.eq.s32.totalorder %s981_s17, 7  ;;  %p1607_p7 = por %p263_p4, %p262_p2 }
  0x1a   : > { %s1989_s19 = scalar_select %p1600_p3, 1, 0 }
  0x1b   : > { %s1990_s20 = scalar_select %p1607_p7, 1, 0 }
  0x1c   : > { %p982_p8 = scmp.ge.s32.totalorder %s1480_s15, 1  ;;  %p1612_p9 = por %p269_p6, %p268_p5 }
  0x1d   : > { %1991 = sst [smem:[#allocation21_spill]] %s1990_s20  ;;  %p276_p10 = scmp.lt.s32.totalorder %s1480_s15, 9 }
  0x1e   : > { %s1992_s21 = scalar_select %p1612_p9, 1, 0 }
  0x1f   : > { %p1617_p11 = pnand %p982_p8, %p276_p10  ;;  %s1482_s23 = smov [#allocation9]  }
  0x20   : > { %1993 = sst [smem:[#allocation22_spill]] %s1992_s21  ;;  %s292_s24 = sshll.u32 %s1482_s23, 4  ;;  %s293_s24 = int_to_ptr.vmem [resolvable:$true] %s292_s24 }
  0x21   : > { %s1994_s22 = scalar_select %p1617_p11, 1, 0 }
  0x22   : > { %p1080_p12 = pneg %p1617_p11  ;;  %s40_s26 = sadd.s32 1, %s1472_s13 }
  0x23   : > { %s1996_s4 = sld [smem:[#allocation28_spill]] }
  0x24   : > { %p1625_p13 = pnand %p1080_p12, %p1963_p1 }
  0x26   : > { %s1995_s25 = scalar_select %p1625_p13, 1, 0 }
  0x27   : > { %p1972_p2 = pneg %p1625_p13 }
  0x29   : > { %s1204_s18 = scalar_lea.hbm %s1996_s4, 64 }
  0x2a   : > { %p1205_p0 = scmp.ne.s32.totalorder %s1996_s4, %s1204_s18  ;;  %p1211_p6 = scmp.lt.u32.totalorder %s1204_s18, %s1996_s4 }
  0x2c   : > { %p1207_p4 = pnand %p1972_p2, %p1205_p0 }
  0x2e   : > { %p1208_p5 = pneg %p1207_p4 }
  0x30   : > { %p1213_p8 = pnand %p1211_p6, %p1208_p5 }
  0x32   : > { %1216 = shalt.err (!%p1213_p8)
}
  0x33   : > { %s1217_s20 = scalar_lea.vmem %s293_s24, 64  ;;  %p1225_p9 = scmp.lt.s32.totalorder %s293_s24, %s293_s24 }
  0x34   : > { %p1218_p10 = scmp.ne.s32.totalorder %s293_s24, %s1217_s20  ;;  %p1226_p7 = scmp.lt.s32.totalorder %s1217_s20, %s1217_s20 }
  0x36   : > { %p1220_p12 = pnand %p1218_p10, %p1972_p2  ;;  %p1227_p3 = por %p1226_p7, %p1225_p9 }
  0x38   : > { %p1221_p1 = pneg %p1220_p12 }
  0x3a   : > { %p1228_p11 = pnand %p1227_p3, %p1221_p1 }
  0x3c   : > { %1231 = shalt.err (!%p1228_p11)
}
  0x3d   : > { %1083 = dma.hbm_to_vmem [thread:$0]  (!%p1625_p13), %s1996_s4, 64, %s293_s24, [#allocation10]  }
  0x3e   : > { %p41_p1 = scmp.ge.s32.totalorder %s40_s26, 4  ;;  %s47_s8 = sadd.s32 1, %s1476_s14 }
  0x3f   : > { %s58_s18 = sadd.s32 1, %s1460_s10  ;;  %p65_p3 = scmp.ne.s32.totalorder %s1460_s10, %s1456_s9 }
  0x40   : > { %s2038_s26 = smov (%p41_p1, %s40_s26), 0  ;;  %s2040_s8 = smov (!%p41_p1, %s47_s8), %s1476_s14 }
  0x41   : > { %1997 = sst [smem:[#allocation23_spill]] %s2038_s26  ;;  %s52_s20 = ssub.s32 %s1472_s13, %s2038_s26 }
  0x42   : > { %p66_p7 = scmp.eq.s32.totalorder %s1480_s15, 0  ;;  %p49_p9 = scmp.ge.s32.totalorder %s2040_s8, 2 }
  0x43   : > { %p1103_p11 = scmp.lt.s32.totalorder %s1480_s15, 8  ;;  %s1968_s30 = sand.u32 1, %s1460_s10  }
  0x44   : > { %p1663_p0 = por %p66_p7, %p65_p3  ;;  %s2042_s8 = smov (%p49_p9, %s2040_s8), 0 }
  0x45   : > { %1999 = sst [smem:[#allocation24_spill]] %s2042_s8  ;;  %s1672_s17 = sshll.u32 %s1968_s30, 3 }
  0x46   : > { %s987_s23 = sshll.u32 %s1476_s14, 2  ;;  %s51_s27 = ssub.s32 %s1476_s14, %s2042_s8 }
  0x47   : > { %s327_s21 = sadd.s32 %s1472_s13, %s987_s23  ;;  %s53_s4 = sor.u32 %s52_s20, %s51_s27 }
  0x48   : > { %p250_p4 = scmp.eq.s32.totalorder %s51_s27, 0  ;;  %p56_p5 = scmp.eq.s32.totalorder %s53_s4, 0 }
  0x49   : > { %s1678_s26 = sshll.u32 %s327_s21, 7  ;;  %s2000_s12 = sadd.s32 1, %s1448_s29 }
  0x4a   : > { %s1683_s7 = scalar_select %p250_p4, %s1448_s29, %s2000_s12  }
  0x4b   : > { %s1686_s3 = scalar_select %p56_p5, %s1460_s10, %s58_s18  }
  0x4c   : > { %p1692_p6 = pnand %p1103_p11, %p1663_p0  ;;  %s338_s8 = sand.u32 1, %s1480_s15  }
  0x4d   : > { %2001 = sst [smem:[#allocation25_spill]] %s1686_s3  ;;  %s2003_s1 = sld [smem:[#allocation26_spill]] }
  0x4e   : > { %s2002_s30 = scalar_select %p1692_p6, 1, 0 }
  0x4f   : > { %s342_s12 = scalar_lea.vmem [#allocation6], %s1672_s17  ;;  %s1483_s24 = smov [#allocation11]  }
  0x50   : > { %s351_s18 = sshll.u32 %s342_s12, 4  ;;  %s1706_s27 = sshll.u32 %s1483_s24, 4  ;;  %s1704_s18 = int_to_ptr.vmem [resolvable:$true] %s351_s18  ;;  %s304_s27 = int_to_ptr.vmem [resolvable:$true] %s1706_s27 }
  0x51   : > { %s1708_s21 = scalar_lea.sflag [#allocation7], %s338_s8  ;;  %p1714_p10 = pneg %p1692_p6 }
  0x53   : > { %s1701_s4 = scalar_lea.hbm %s2003_s1, %s1678_s26  ;;  %s1237_s13 = scalar_lea.hbm %s2003_s1, 1024 }
  0x54   : > { %s1232_s14 = scalar_lea.hbm %s1701_s4, 128  ;;  %p1238_p3 = scmp.lt.u32.totalorder %s1701_s4, %s2003_s1 }
  0x55   : > { %p1233_p8 = scmp.ne.s32.totalorder %s1701_s4, %s1232_s14  ;;  %p1239_p7 = scmp.lt.u32.totalorder %s1237_s13, %s1232_s14 }
  0x56   : > { %s2004_s23 = scalar_select %p1714_p10, 1, 0 }
  0x57   : > { %p1235_p12 = pnand %p1714_p10, %p1233_p8  ;;  %p1240_p9 = por %p1239_p7, %p1238_p3 }
  0x58   : > { %p1241_p11 = scmp.lt.u32.totalorder %s1232_s14, %s1701_s4 }
  0x59   : > { %p1236_p1 = pneg %p1235_p12 }
  0x5a   : > { %p1242_p0 = por %p1241_p11, %p1240_p9 }
  0x5c   : > { %p1243_p4 = pnand %p1242_p0, %p1236_p1 }
  0x5e   : > { %1246 = shalt.err (!%p1243_p4)
}
  0x5f   : > { %s1247_s8 = scalar_lea.vmem %s1704_s18, 128  ;;  %s1484_s20 = smov [#allocation6]  }
  0x60   : > { %p1248_p5 = scmp.ne.s32.totalorder %s1704_s18, %s1247_s8  ;;  %s1252_s12 = sshll.u32 %s1484_s20, 4  ;;  %s1253_s12 = int_to_ptr.vmem [resolvable:$false] %s1252_s12 }
  0x61   : > { %s1254_s3 = scalar_lea.vmem %s1253_s12, 256  ;;  %p1255_p2 = scmp.lt.s32.totalorder %s1704_s18, %s1253_s12 }
  0x62   : > { %p1250_p8 = pnand %p1248_p5, %p1714_p10  ;;  %p1256_p13 = scmp.lt.s32.totalorder %s1254_s3, %s1247_s8 }
  0x64   : > { %p1251_p12 = pneg %p1250_p8  ;;  %p1257_p3 = por %p1256_p13, %p1255_p2 }
  0x66   : > { %p1258_p7 = pnand %p1257_p3, %p1251_p12 }
  0x68   : > { %1261 = shalt.err (!%p1258_p7)
}
  0x69   : > { %1093 = dma.hbm_to_vmem [thread:$0]  (!%p1692_p6), %s1701_s4, 128, %s1704_s18, %s1708_s21  }
  0x6a   : > { %s2005_s5 = sld [smem:[#allocation29_spill]]  ;;  %p2006_p13 = scmp.ne.s32.totalorder %s1995_s25, 0 }
  0x6c   : > { %p2007_p2 = pneg %p2006_p13 }
  0x70   : > { %s1262_s24 = scalar_lea.hbm %s2005_s5, 64 }
  0x71   : > { %p1263_p1 = scmp.ne.s32.totalorder %s2005_s5, %s1262_s24  ;;  %p1269_p0 = scmp.lt.u32.totalorder %s1262_s24, %s2005_s5 }
  0x73   : > { %p1265_p9 = pnand %p1263_p1, %p2007_p2 }
  0x75   : > { %p1266_p11 = pneg %p1265_p9 }
  0x77   : > { %p1271_p4 = pnand %p1269_p0, %p1266_p11 }
  0x79   : > { %1274 = shalt.err (!%p1271_p4)
}
  0x7a   : > { %s1275_s4 = scalar_lea.vmem %s304_s27, 64  ;;  %p2008_p8 = pmov %p2007_p2 }
  0x7b   : > { %p1276_p5 = scmp.ne.s32.totalorder %s304_s27, %s1275_s4  ;;  %p1283_p7 = scmp.lt.s32.totalorder %s304_s27, %s304_s27 }
  0x7c   : > { %p1284_p6 = scmp.lt.s32.totalorder %s1275_s4, %s1275_s4 }
  0x7d   : > { %p1278_p12 = pnand %p1276_p5, %p2008_p8 }
  0x7e   : > { %p1285_p10 = por %p1284_p6, %p1283_p7 }
  0x7f   : > { %p1279_p3 = pneg %p1278_p12 }
  0x81   : > { %p1286_p1 = pnand %p1285_p10, %p1279_p3 }
  0x83   : > { %1289 = shalt.err (!%p1286_p1)
}
  0x84   : > { %1086 = dma.hbm_to_vmem [thread:$0]  (!%p2006_p13), %s2005_s5, 64, %s304_s27, [#allocation10]  }
  0x85   : > { %s1763_s14 = scalar_lea.hbm %s1949_s0, %s1678_s26  ;;  %s321_s24 = scalar_lea.vmem [#allocation3], %s1672_s17 }
  0x86   : > { %s331_s25 = sshll.u32 %s321_s24, 4  ;;  %s1772_s12 = scalar_lea.hbm %s1951_s2, %s1678_s26  ;;  %s1766_s25 = int_to_ptr.vmem [resolvable:$true] %s331_s25 }
  0x87   : > { %s2009_s4 = sand.u32 1, %s1460_s10   ;;  %s1290_s1 = scalar_lea.hbm %s1763_s14, 128 }
  0x88   : > { %s318_s27 = scalar_lea.sflag [#allocation4], %s2009_s4  ;;  %p1291_p6 = scmp.ne.s32.totalorder %s1763_s14, %s1290_s1 }
  0x89   : > { %p2010_p10 = scmp.ne.s32.totalorder %s2004_s23, 0  ;;  %s1295_s13 = scalar_lea.hbm %s1949_s0, 1024 }
  0x8a   : > { %p1296_p9 = scmp.lt.u32.totalorder %s1763_s14, %s1949_s0  ;;  %p1297_p11 = scmp.lt.u32.totalorder %s1295_s13, %s1290_s1 }
  0x8b   : > { %p1293_p13 = pnand %p1291_p6, %p2010_p10  ;;  %p1299_p4 = scmp.lt.u32.totalorder %s1290_s1, %s1763_s14 }
  0x8c   : > { %p1298_p0 = por %p1297_p11, %p1296_p9 }
  0x8d   : > { %p1294_p2 = pneg %p1293_p13 }
  0x8e   : > { %p1300_p5 = por %p1299_p4, %p1298_p0 }
  0x90   : > { %p1301_p8 = pnand %p1300_p5, %p1294_p2 }
  0x92   : > { %1304 = shalt.err (!%p1301_p8)
}
  0x93   : > { %s1305_s26 = scalar_lea.vmem %s1766_s25, 128  ;;  %s1485_s20 = smov [#allocation3]  }
  0x94   : > { %p1306_p12 = scmp.ne.s32.totalorder %s1766_s25, %s1305_s26  ;;  %s1310_s8 = sshll.u32 %s1485_s20, 4  ;;  %s1311_s8 = int_to_ptr.vmem [resolvable:$false] %s1310_s8 }
  0x95   : > { %s1312_s5 = scalar_lea.vmem %s1311_s8, 256  ;;  %p1313_p1 = scmp.lt.s32.totalorder %s1766_s25, %s1311_s8 }
  0x96   : > { %p1308_p3 = pnand %p1306_p12, %p2010_p10  ;;  %p1314_p6 = scmp.lt.s32.totalorder %s1312_s5, %s1305_s26 }
  0x98   : > { %p1309_p7 = pneg %p1308_p3  ;;  %p1315_p13 = por %p1314_p6, %p1313_p1 }
  0x9a   : > { %p1316_p9 = pnand %p1315_p13, %p1309_p7 }
  0x9c   : > { %1319 = shalt.err (!%p1316_p9)
}
  0x9d   : > { %p2011_p2 = scmp.ne.s32.totalorder %s2002_s30, 0  ;;  %s362_s4 = scalar_lea.vmem [#allocation8], %s1672_s17 }
  0x9e   : > { %s371_s1 = sshll.u32 %s362_s4, 4  ;;  %s1320_s18 = scalar_lea.hbm %s1772_s12, 128  ;;  %s372_s1 = int_to_ptr.vmem [resolvable:$true] %s371_s1 }
  0x9f   : > { %1090 = dma.hbm_to_vmem [thread:$0]  (!%p2011_p2), %s1763_s14, 128, %s1766_s25, %s318_s27  }
  0xa0   : > { %p1321_p11 = scmp.ne.s32.totalorder %s1772_s12, %s1320_s18  ;;  %s1325_s24 = scalar_lea.hbm %s1951_s2, 1024 }
  0xa1   : > { %p1326_p5 = scmp.lt.u32.totalorder %s1772_s12, %s1951_s2  ;;  %p1327_p8 = scmp.lt.u32.totalorder %s1325_s24, %s1320_s18 }
  0xa2   : > { %p1323_p0 = pnand %p1321_p11, %p2010_p10  ;;  %p1329_p3 = scmp.lt.u32.totalorder %s1320_s18, %s1772_s12 }
  0xa3   : > { %p1328_p12 = por %p1327_p8, %p1326_p5 }
  0xa4   : > { %p1324_p4 = pneg %p1323_p0 }
  0xa5   : > { %p1330_p7 = por %p1329_p3, %p1328_p12 }
  0xa7   : > { %p1331_p1 = pnand %p1330_p7, %p1324_p4 }
  0xa9   : > { %1334 = shalt.err (!%p1331_p1)
}
  0xaa   : > { %s1335_s17 = scalar_lea.vmem %s372_s1, 128  ;;  %s1486_s14 = smov [#allocation8]  }
  0xab   : > { %p1336_p6 = scmp.ne.s32.totalorder %s372_s1, %s1335_s17  ;;  %s1340_s25 = sshll.u32 %s1486_s14, 4  ;;  %s1341_s25 = int_to_ptr.vmem [resolvable:$false] %s1340_s25 }
  0xac   : > { %s1342_s27 = scalar_lea.vmem %s1341_s25, 256  ;;  %p1343_p11 = scmp.lt.s32.totalorder %s372_s1, %s1341_s25 }
  0xad   : > { %p1338_p13 = pnand %p1336_p6, %p2010_p10  ;;  %p1344_p0 = scmp.lt.s32.totalorder %s1342_s27, %s1335_s17 }
  0xaf   : > { %p1339_p9 = pneg %p1338_p13  ;;  %p1345_p2 = por %p1344_p0, %p1343_p11 }
  0xb1   : > { %p1346_p5 = pnand %p1345_p2, %p1339_p9 }
  0xb3   : > { %1349 = shalt.err (!%p1346_p5)
}
  0xb4   : > { %p2012_p8 = scmp.ne.s32.totalorder %s2002_s30, 0  ;;  %p2013_p4 = scmp.ne.s32.totalorder %s1994_s22, 0 }
  0xb5   : > { %s389_s23 = sand.u32 (!%p2013_p4), 1, %s1456_s9   ;;  %p2014_p10 = scmp.ne.s32.totalorder (!%p2013_p4), %s1989_s19, 0 }
  0xb6   : > { %1096 = dma.hbm_to_vmem [thread:$0]  (!%p2012_p8), %s1772_s12, 128, %s372_s1, %s1708_s21  }
  0xb7   : > { %387 = sbr.rel (%p2013_p4) target bundleno = 1428 (0x594), region = 52  ;;  %s1819_s8 = sshll.u32 (!%p2013_p4), %s389_s23, 3 }
  0xb8   : > { %s390_s5 = scalar_lea.sflag (!%p2013_p4), [#allocation4], %s389_s23  ;;  %s393_s4 = scalar_lea.vmem (!%p2013_p4), [#allocation3], %s1819_s8 }
  0xbe   : > { %1423 = dma.done.wait (%p2014_p10), %s390_s5, 128  }
  0xbf   : > { %1425 = vsyncadd (%p2014_p10), %s390_s5, 4294967168  ;;  %s398_s30 = sand.u32 1, %s1590_s16   ;;  %s402_s22 = scalar_lea.vmem [#allocation6], %s1819_s8 }
  0xc0   : > { %s399_s21 = scalar_lea.sflag [#allocation7], %s398_s30 }
  0xc1   : > { %1427 = dma.done.wait (%p2014_p10), %s399_s21, 256  }
  0xc2   : > { %1429 = vsyncadd (%p2014_p10), %s399_s21, 4294967040  ;;  %s411_s12 = scalar_lea.vmem [#allocation8], %s1819_s8  ;;  %p2015_p2 = scmp.eq.s32.totalorder %s1590_s16, 0 }
  0xc4   : > { %1431 = dma.done.wait (%p2015_p2), [#allocation10], 128   ;;  %p2016_p12 = pmov %p2015_p2 }
  0xc5   : > { %s463_s1 = sand.u32 1, %s1444_s28   ;;  %p466_p3 = scmp.lt.s32.totalorder %s1464_s11, 3 }
  0xc6   : > { %1433 = vsyncadd (%p2016_p12), [#allocation10], 4294967168  ;;  %s1841_s18 = sshll.u32 %s463_s1, 3  ;;  %p1003_p7 = scmp.ne.s32.totalorder %s1464_s11, 0 }
  0xc7   : > { %s467_s19 = scalar_select %p466_p3, %s1464_s11, 3 }
  0xc8   : > { %s465_s20 = scalar_lea.vmem [#allocation12], %s1841_s18  ;;  %474 = sbr.rel (%p1003_p7) target bundleno = 207 (0xcf), region = 76  ;;  %vm475_vm0 = vcmask (!%p1003_p7), 261120   ;;  %v1487_v0 = vmov (!%p1003_p7), 0.0  }
  0xc9   : > { %s1002_s3 = sshll.u32 %s467_s19, 2  ;;  %476 = vst.msk [vmem:[#allocation2] sm:$0xff] (!%p1003_p7), %vm475_vm0, %v1487_v0 }
  0xca   : > { %s1847_s26 = scalar_lea.vmem %s1955_s6, %s1002_s3 }
  0xcf PF: > { %vm488_vm1 = vcmask 1043456   ;;  %v532_v1 = vld [vmem:[#allocation9] sm:$0xf]  ;;  %v1488_v3 = vmov 0.0   ;;  %vm1489_vm2 = vmmov 0   ;;  %s2017_s14 = sld [smem:[#allocation27_spill]] }
  0xd0   : > { %v479_v2 = vld [vmem:[%s402_s22] sm:$0xff]  ;;  %1034 = vmatprep.subr.bf16.mxu1 %v1488_v3  ;;  %v537_v4 = vsel %vm488_vm1, %v532_v1, 0  ;;  %1036 = vmatprep.mubr.msk.bf16.mxu1 %vm1489_vm2, %v1488_v3  ;;  %v477_v7 = vld [vmem:[%s393_s4] sm:$0xff]  ;;  %vm484_vm3 = vcmask 64512   ;;  %vm783_vm4 = vcmask 261120   ;;  %p1010_p1 = scmp.ne.s32.totalorder %s1464_s11, 3 }
  0xd1   : > { %v480_v5 = vpack.c.bf16 %v479_v2, %v479_v2  ;;  %1035 = vmatpush3.bf16.msra.mxu1 %v537_v4  ;;  %1028 = vmatprep.subr.bf16.mxu0 %v1488_v3  ;;  %v478_v9 = vpack.c.bf16 %v477_v7, %v477_v7  ;;  %v579_v21 = vld [vmem:[#allocation11] sm:$0xf]  ;;  %v481_v22 = vld [vmem:[%s411_s12] sm:$0xff]  ;;  %v735_v41 = vld [vmem:[%s1847_s26] sm:$0xf]  ;;  %s2018_s23 = sld [smem:[#allocation30_spill]] (!%p1010_p1) }
  0xd2   : > { %1030 = vmatprep.mubr.msk.bf16.mxu0 %vm1489_vm2, %v1488_v3  ;;  %1046 = vmatprep.subr.bf16.mxu1 %v1488_v3  ;;  %v584_v23 = vsel %vm488_vm1, %v579_v21, 0  ;;  %v482_v24 = vpack.c.bf16 %v481_v22, %v481_v22  ;;  %v740_v42 = vsel %vm488_vm1, %v735_v41, 0  ;;  %v733_v52 = vld [vmem:[#allocation2] sm:$0xff] }
  0xd4   : > { %1037 = vmatmul.mubr.msk.bf16.vlgmr.msra.gmra.mrb[0].mxu1 %vm484_vm3, %v480_v5 }
  0xd5   : > { %v483_v6 = vld [vmem:[%s2017_s14] sm:$0xf]  ;;  %1048 = vmatprep.mubr.msk.bf16.mxu1 %vm1489_vm2, %v1488_v3 }
  0xd6   : > { %v490_v8 = vsel %vm488_vm1, %v483_v6, 0 }
  0xd7   : > { %1029 = vmatpush3.bf16.msra.mxu0 %v490_v8  ;;  %v1011_v59 = vld [vmem:[%s2018_s23] ss:$0 sm:$0xff] (!%p1010_p1) }
  0xd8   : > { %1040 = vmatprep.subr.bf16.mxu0 %v1488_v3 }
  0xda   : > { %1031 = vmatmul.mubr.msk.bf16.vlgmr.msra.gmra.mrb[0].mxu0 %vm484_vm3, %v478_v9 }
  0xdb   : > { %1042 = vmatprep.mubr.msk.bf16.mxu0 %vm1489_vm2, %v1488_v3  ;;  %1041 = vmatpush3.bf16.msra.mxu0 %v584_v23 }
  0xdc   : > { %1052 = vmatprep.subr.bf16.mxu0 %v1488_v3 }
  0xe2   : > { %1043 = vmatmul.mubr.msk.bf16.vlgmr.msra.gmra.mrb[4].mxu0 %vm484_vm3, %v482_v24 }
  0xe3   : > { %1054 = vmatprep.mubr.msk.bf16.mxu0 %vm1489_vm2, %v1488_v3 }
 0x1a7   : > { %v573_v10 = vpop.f32.mrb[0].mxu1 }
 0x1a8   : > { %v627_v11 = vpack.c.bf16 %v573_v10, %v573_v10  ;;  %v1038_v12 = vpop.f32.mrb[1].mxu1 }
 0x1a9   : > { %v576_v14 = vpop.f32.mrb[2].mxu1 }
 0x1aa   : > { %v632_v16 = vsel %vm484_vm3, %v627_v11, 0  ;;  %v1039_v17 = vpop.f32.mrb[3].mxu1 }
 0x1ab   : > { %1047 = vmatpush3.bf16.xpose.msra.mxu1 %v632_v16 }
 0x1ac   : > { %1058 = vmatprep.subr.bf16.mxu1 %v1488_v3 }
 0x1ad   : > { %v526_v13 = vpop.f32.mrb[0].mxu0 }
 0x1ae   : > { %v1032_v15 = vpop.f32.mrb[1].mxu0  ;;  %v626_v20 = vpack.c.bf16 %v526_v13, %v526_v13 }
 0x1af   : > { %v529_v18 = vpop.f32.mrb[2].mxu0 }
 0x1b0   : > { %v1033_v19 = vpop.f32.mrb[3].mxu0 }
 0x1b2   : > { %1049 = vmatmul.mubr.msk.bf16.vlgmr.msra.gmra.mrb[4].mxu1 %vm484_vm3, %v626_v20 }
 0x1b3   : > { %1060 = vmatprep.mubr.msk.bf16.mxu1 %vm1489_vm2, %v1488_v3  ;;  %1059 = vmatpush3.bf16.msra.mxu1 %v740_v42 }
 0x1b5   : > { %v620_v35 = vpop.f32.mrb[4].mxu0 }
 0x1b6   : > { %v1044_v36 = vpop.f32.mrb[5].mxu0  ;;  %v686_v39 = vpack.c.bf16 %v620_v35, %v620_v35 }
 0x1b7   : > { %v623_v37 = vpop.f32.mrb[6].mxu0 }
 0x1b8   : > { %v1045_v38 = vpop.f32.mrb[7].mxu0  ;;  %v691_v40 = vsel %vm488_vm1, %v686_v39, 0 }
 0x1b9   : > { %1053 = vmatpush3.bf16.msra.mxu0 %v691_v40 }
 0x285   : > { %v668_v25 = vpop.f32.mrb[4].mxu1 }
 0x286   : > { %v1050_v26 = vpop.f32.mrb[5].mxu1  ;;  %v674_v27 = vsel %vm484_vm3, %v668_v25, -inf }
 0x287   : > { %675 = vmax.xlane.f32.xlu0 %v674_v27  ;;  %v671_v28 = vpop.f32.mrb[6].mxu1 }
 0x288   : > { %v1051_v29 = vpop.f32.mrb[7].mxu1 }
 0x314   : > { %v676_v30 = vpop.xlane.xlu0 %675 }
 0x315   : > { %v677_v31 = vsub.f32 %v668_v25, %v676_v30 }
 0x317   : > { %v678_v32 = vmul.f32 1.442695, %v677_v31 }
 0x319   : > { %1200 = vpow2.f32 %v678_v32 }
 0x323   : > { %v1201_v33 = vpop.eup %1200 }
 0x324   : > { %v680_v34 = vsel %vm484_vm3, %v1201_v33, 0.0 }
 0x325   : > { %681 = vadd.xlane.f32.xlu0 %v680_v34 }
 0x3b2   : > { %v682_v43 = vpop.xlane.xlu0 %681 }
 0x3b3   : > { %1202 = vrcp.f32 %v682_v43 }
 0x3bd   : > { %v1203_v44 = vpop.eup %1202 }
 0x3be   : > { %v684_v45 = vmul.f32 %v1203_v44, %v1201_v33 }
 0x3c0   : > { %v685_v46 = vpack.c.bf16 %v684_v45, %v684_v45 }
 0x3c2   : > { %1055 = vmatmul.mubr.msk.bf16.vlgmr.msra.gmra.mrb[8].mxu0 %vm484_vm3, %v685_v46 }
 0x495   : > { %v727_v47 = vpop.f32.mrb[8].mxu0 }
 0x496   : > { %v734_v48 = vpack.c.bf16 %v727_v47, %v727_v47  ;;  %v1056_v49 = vpop.f32.mrb[9].mxu0 }
 0x497   : > { %v730_v50 = vpop.f32.mrb[10].mxu0 }
 0x498   : > { %v1057_v51 = vpop.f32.mrb[11].mxu0  ;;  %1061 = vmatmul.mubr.msk.bf16.vlgmr.msra.gmra.mrb[8].mxu1 %vm484_vm3, %v734_v48 }
 0x568   : > { %788 = sbr.rel (%p1010_p1) target bundleno = 1401 (0x579), region = 80 }
 0x56b   : > { %v776_v53 = vpop.f32.mrb[8].mxu1 }
 0x56c   : > { %v782_v54 = vadd.f32 %v776_v53, %v733_v52  ;;  %v1062_v55 = vpop.f32.mrb[9].mxu1 }
 0x56d   : > { %v779_v56 = vpop.f32.mrb[10].mxu1 }
 0x56e   : > { %784 = vst.msk [vmem:[#allocation2] sm:$0xff] %vm783_vm4, %v782_v54  ;;  %v1063_v57 = vpop.f32.mrb[11].mxu1 }
 0x575   : > { %v789_v58 = vld [vmem:[#allocation2] sm:$0xff] }
 0x576   : > { %v797_v60 = vadd.f32 %v1011_v59, %v789_v58 }
 0x578   : > { %798 = vst.msk [vmem:[%s465_s20] sm:$0xff] %vm783_vm4, %v797_v60 }
 0x579 PF: > { %s2019_s8 = sld [smem:[#allocation18_spill]]  ;;  %s2020_s5 = sld [smem:[#allocation21_spill]] }
 0x57a   : > { %s2021_s22 = sld [smem:[#allocation31_spill]]  ;;  %s814_s12 = sshll.u32 %s465_s20, 4  ;;  %s815_s12 = int_to_ptr.vmem [resolvable:$true] %s814_s12 }
 0x57b   : > { %s800_s19 = scalar_lea.sflag [#allocation5], %s463_s1  ;;  %s1350_s3 = scalar_lea.vmem %s815_s12, 128 }
 0x57c   : > { %p1351_p6 = scmp.ne.s32.totalorder %s815_s12, %s1350_s3  ;;  %s1490_s13 = smov [#allocation12]  }
 0x57d   : > { %s1354_s24 = sshll.u32 %s1490_s13, 4  ;;  %s1355_s24 = int_to_ptr.vmem [resolvable:$false] %s1354_s24 }
 0x57e   : > { %s1356_s26 = scalar_lea.vmem %s1355_s24, 256  ;;  %p1357_p0 = scmp.lt.s32.totalorder %s815_s12, %s1355_s24 }
 0x57f   : > { %s1013_s4 = sshll.u32 %s2019_s8, 7  ;;  %p2022_p13 = scmp.ne.s32.totalorder %s2020_s5, 0 }
 0x580   : > { %s1889_s11 = scalar_lea.hbm %s2021_s22, %s1013_s4  ;;  %p1358_p5 = scmp.lt.s32.totalorder %s1356_s26, %s1350_s3 }
 0x581   : > { %p1352_p9 = pnand %p1351_p6, %p2022_p13 }
 0x582   : > { %p1359_p8 = por %p1358_p5, %p1357_p0 }
 0x583   : > { %p1353_p11 = pneg %p1352_p9 }
 0x585   : > { %p1360_p4 = pnand %p1359_p8, %p1353_p11 }
 0x587   : > { %1363 = shalt.err (!%p1360_p4)
}
 0x588   : > { %s1364_s1 = scalar_lea.hbm %s1889_s11, 128  ;;  %s1368_s16 = scalar_lea.hbm %s2021_s22, 256 }
 0x589   : > { %p1365_p10 = scmp.ne.s32.totalorder %s1889_s11, %s1364_s1  ;;  %p1369_p3 = scmp.lt.u32.totalorder %s1889_s11, %s2021_s22 }
 0x58a   : > { %p1370_p7 = scmp.lt.u32.totalorder %s1368_s16, %s1364_s1  ;;  %p1372_p6 = scmp.lt.u32.totalorder %s1364_s1, %s1889_s11 }
 0x58b   : > { %p1366_p2 = pnand %p1365_p10, %p2022_p13 }
 0x58c   : > { %p1371_p1 = por %p1370_p7, %p1369_p3 }
 0x58d   : > { %p1367_p12 = pneg %p1366_p2 }
 0x58e   : > { %p1373_p9 = por %p1372_p6, %p1371_p1 }
 0x590   : > { %p1374_p11 = pnand %p1373_p9, %p1367_p12 }
 0x592   : > { %1377 = shalt.err (!%p1374_p11)
}
 0x593   : > { %1078 = dma.vmem_to_hbm [thread:$0]  (%p2022_p13), %s815_s12, 128, %s1889_s11, %s800_s19  }
 0x594 PF: > { %s2023_s25 = sld [smem:[#allocation17_spill]]  ;;  %s2024_s27 = sld [smem:[#allocation22_spill]] }
 0x595   : > { %p1106_p0 = scmp.ge.s32.totalorder %s1480_s15, 2 }
 0x59a   : > { %s826_s23 = sand.u32 1, %s2023_s25   ;;  %p2025_p5 = scmp.ne.s32.totalorder %s2024_s27, 0 }
 0x59b   : > { %s827_s8 = scalar_lea.sflag [#allocation5], %s826_s23 }
 0x59c   : > { %p1098_p8 = pnand %p1106_p0, %p2025_p5 }
 0x59e   : > { %1435 = dma.done.wait (!%p1098_p8), %s827_s8, 128  }
 0x59f   : > { %1437 = vsyncadd (!%p1098_p8), %s827_s8, 4294967168  ;;  %s28_s15 = sadd.s32 1, %s1480_s15   ;;  %s2026_s5 = sld [smem:[#allocation25_spill]] }
 0x5a0   : > { %p25_p4 = scmp.ge.s32.totalorder %s28_s15, 10   ;;  %s2027_s11 = sld [smem:[#allocation19_spill]] }
 0x5a1   : > { %s2028_s12 = sld [smem:[#allocation20_spill]]  ;;  %s2029_s13 = sld [smem:[#allocation23_spill]] }
 0x5a2   : > { %s2030_s14 = sld [smem:[#allocation24_spill]]  ;;  %s2031_s27 = smov %s1444_s28 }
 0x5a3   : > { %s2032_s28 = smov %s1448_s29  ;;  %s2033_s29 = smov %s1683_s7 }
 0x5a4   : > { %s2034_s30 = smov %s1456_s9  ;;  %s2035_s9 = smov %s1460_s10 }
 0x5a5   : > { %s2036_s10 = smov %s2026_s5  ;;  %27 = sbr.rel (!%p25_p4) target bundleno = 19 (0x13), region = 140 }
 0x5ac   :  { %832 = vsyncpa [#allocation4], 1 }
 0x5ad   :  { %834 = vsyncpa [#allocation4 + $0x1], 1 }
 0x5ae   :  { %835 = vsyncpa [#allocation7], 1 }
 0x5af   :  { %837 = vsyncpa [#allocation7 + $0x1], 1 }
 0x5b0   :  { %838 = vsyncpa [#allocation10], 1 }
 0x5b1   :  { %839 = vsyncpa [#allocation5], 1 }
 0x5b2   :  { %841 = vsyncpa [#allocation5 + $0x1], 1 }

</bundles_post_ra>
